<compile_context>
chip_gen: v7x
topology: tpu7x:2x2x1
jax: 0.10.0
libtpu: 0.0.40
codegen_flags: <defaults>
</compile_context>

<pallas_src>
import functools

import jax
import jax.numpy as jnp
from jax import lax
from jax.experimental import pallas as pl
from jax.experimental.pallas import tpu as pltpu

_LANES = 128
_SUBLANES = 8
_TILE_ELEMS = _SUBLANES * _LANES          # 1024; slabs are padded to this granule
_SMALL_ROWS = 1024                        # <= 512 KiB f32 -> single block
_TARGET_BLOCK_BYTES = 4 * 1024 * 1024     # ~4 MiB of inputs per grid step
_VMEM_LIMIT_BYTES = 32 * 1024 * 1024      # safe on v5e/v6e/v7x


def _partial_sum_kernel(*refs, block_rows, tail_rows, weighted, unroll):
    """Per-block partial sum of (optionally weighted) loss into an (8,128) vreg."""
    if weighted:
        x_ref, w_ref, o_ref = refs
    else:
        x_ref, o_ref = refs
        w_ref = None

    def block_sum(n_rows):
        # n_rows is a compile-time int and always a multiple of 8.
        n_chunks = n_rows // _SUBLANES

        def body(c, acc):
            start = pl.multiple_of(c * _SUBLANES, _SUBLANES)
            xv = x_ref[pl.ds(start, _SUBLANES), :].astype(jnp.float32)
            if weighted:
                # w_ref block is (block_rows, 1) f32 (compact per-row weight) or
                # (block_rows, 128) f32 (materialized fallback); both broadcast.
                xv = xv * w_ref[pl.ds(start, _SUBLANES), :]
            return acc + xv

        return lax.fori_loop(
            0, n_chunks, body,
            jnp.zeros((_SUBLANES, _LANES), jnp.float32),
            unroll=min(unroll, n_chunks))

    if tail_rows == 0:
        o_ref[0] = block_sum(block_rows)
    else:
        i = pl.program_id(0)
        last = pl.num_programs(0) - 1

        @pl.when(i != last)
        def _():
            o_ref[0] = block_sum(block_rows)

        @pl.when(i == last)
        def _():
            o_ref[0] = block_sum(tail_rows)   # static count; never reads padding


def _flatten_to_slab(flat):
    """Flatten to a lane-dense [rows, 128] slab; rows is a multiple of 8."""
    n = flat.size
    rem = n % _TILE_ELEMS
    if rem:
        # TODO(synk): fallback pad (one extra HBM copy); losses whose numel is a
        # multiple of 1024 (typical NCHW sizes) skip this path entirely.
        flat = jnp.pad(flat, (0, _TILE_ELEMS - rem))
    return flat.reshape(-1, _LANES)


def _per_row_class_weight(weight, x_shape, axis):
    """(numel//128,)-long f32 per-row weight, or None if rows mix classes."""
    trailing = 1
    for s in x_shape[axis + 1:]:
        trailing *= s
    if trailing % _LANES != 0:
        return None
    lead = 1
    for s in x_shape[:axis]:
        lead *= s
    c = x_shape[axis]
    reps = trailing // _LANES
    w = jnp.asarray(weight, jnp.float32).reshape(c)
    # Flattened row r of x belongs to channel (r // reps) % c.
    return jnp.tile(jnp.repeat(w, reps), lead)


def _choose_block_rows(rows, x_itemsize, w_row_bytes, requested):
    if requested is not None:
        if requested >= rows:
            return rows
        return max(_SUBLANES, (requested // _SUBLANES) * _SUBLANES)
    if rows <= _SMALL_ROWS:
        return rows                                  # single block, single step
    bytes_per_row = _LANES * x_itemsize + w_row_bytes
    target = max(_SUBLANES,
                 (_TARGET_BLOCK_BYTES // bytes_per_row) // _SUBLANES * _SUBLANES)
    # Keep at least 2 blocks so both v7x TensorCores get work on mid-size inputs.
    half = (((rows + 1) // 2) + _SUBLANES - 1) // _SUBLANES * _SUBLANES
    return min(target, half)


def _reduce_sum(x_slab, w_operand, *, block_rows=None):
    """Fused global sum of an (optionally per-row-weighted) [rows,128] slab."""
    rows = x_slab.shape[0]
    w_row_bytes = 0 if w_operand is None else w_operand.shape[1] * 4
    block_rows = _choose_block_rows(rows, x_slab.dtype.itemsize, w_row_bytes,
                                    block_rows)
    full_blocks = rows // block_rows
    tail_rows = rows - full_blocks * block_rows
    grid_len = full_blocks + (1 if tail_rows else 0)

    in_specs = [pl.BlockSpec((block_rows, _LANES), lambda i: (i, 0))]
    operands = [x_slab]
    if w_operand is not None:
        in_specs.append(pl.BlockSpec((block_rows, w_operand.shape[1]),
                                     lambda i: (i, 0)))
        operands.append(w_operand)

    kern = functools.partial(
        _partial_sum_kernel, block_rows=block_rows, tail_rows=tail_rows,
        weighted=w_operand is not None, unroll=8)

    partials = pl.pallas_call(
        kern,
        out_shape=jax.ShapeDtypeStruct((grid_len, _SUBLANES, _LANES),
                                       jnp.float32),
        grid_spec=pltpu.PrefetchScalarGridSpec(
            num_scalar_prefetch=0,
            grid=(grid_len,),
            in_specs=in_specs,
            out_specs=pl.BlockSpec((1, _SUBLANES, _LANES), lambda i: (i, 0, 0)),
        ),
        compiler_params=pltpu.CompilerParams(
            dimension_semantics=("parallel",),     # megacore-shardable on v7x
            vmem_limit_bytes=_VMEM_LIMIT_BYTES,
        ),
    )(*operands)

    # Tiny finalize (grid_len * 1024 floats) done by XLA in the wrapper.
    return jnp.sum(partials, dtype=jnp.float32)


def loss_reduce(x, reduction="mean", weight=None, weight_axis=1,
                block_rows=None):
    """Apply _WeightedLoss-style (optional per-class weight) + _Loss reduction.

    `weight`, if given, is a 1-D per-class vector of length x.shape[weight_axis]
    (torch _WeightedLoss buffer semantics).
    """
    if reduction == "none":
        if weight is None:
            return x
        shape = [1] * x.ndim
        shape[weight_axis] = x.shape[weight_axis]
        return x * jnp.reshape(jnp.asarray(weight, x.dtype), shape)
    if reduction not in ("mean", "sum"):
        raise ValueError(f"unsupported reduction: {reduction!r}")

    n = x.size
    x_slab = _flatten_to_slab(jnp.ravel(x))
    rows = x_slab.shape[0]

    w_operand = None
    if weight is not None:
        w_rows = _per_row_class_weight(weight, x.shape, weight_axis)
        if w_rows is not None:
            if w_rows.size != rows:                  # slab was zero-padded
                w_rows = jnp.pad(w_rows, (0, rows - w_rows.size))
            w_operand = w_rows.reshape(rows, 1)      # compact: 1/128 of x bytes
        else:
            # TODO(synk): trailing extent not lane-aligned -> materialize the
            # broadcast per-element weight once (kept f32 until the multiply).
            shape = [1] * x.ndim
            shape[weight_axis] = x.shape[weight_axis]
            w_full = jnp.broadcast_to(
                jnp.reshape(jnp.asarray(weight, jnp.float32), shape), x.shape)
            w_operand = _flatten_to_slab(jnp.ravel(w_full))

    total = _reduce_sum(x_slab, w_operand, block_rows=block_rows)
    if reduction == "mean":
        # TODO(synk): torch's concrete weighted losses (NLLLoss etc.) divide by
        # the sum of weights for 'mean'; the abstract base gives no rule, so the
        # generic divide-by-numel is used here.
        total = total / n
    # Match torch: reduced loss keeps the input floating dtype.
    return total.astype(x.dtype)


class PallasLoss:
    """JAX/Pallas counterpart of torch.nn.modules.loss._Loss."""

    def __init__(self, reduction="mean"):
        self.reduction = reduction

    def reduce(self, per_element_loss):
        return loss_reduce(per_element_loss, self.reduction)

    def __call__(self, *inputs):
        raise NotImplementedError  # faithful to _Loss.forward


class PallasWeightedLoss(PallasLoss):
    """JAX/Pallas counterpart of torch.nn.modules.loss._WeightedLoss."""

    def __init__(self, weight=None, reduction="mean"):
        super().__init__(reduction)
        self.weight = weight  # torch registers this as a buffer; plain attr here

    def reduce(self, per_element_loss):
        return loss_reduce(per_element_loss, self.reduction,
                           weight=self.weight, weight_axis=1)

    def __call__(self, *inputs):
        raise NotImplementedError  # faithful to _WeightedLoss.forward


if __name__ == "__main__":
    key = jax.random.PRNGKey(0)
    k1, k2, k3, k4 = jax.random.split(key, 4)

    # NCHW per-element loss; 2*4*16*16 = 2048 elements -> 16 lane rows, no pad.
    x = jax.random.uniform(k1, (2, 4, 16, 16), dtype=jnp.float32)

    # 'mean'
    out_mean = jax.block_until_ready(PallasWeightedLoss(reduction="mean").reduce(x))
    assert jnp.allclose(out_mean, jnp.mean(x), rtol=1e-5, atol=1e-5), out_mean

    # 'sum'
    out_sum = jax.block_until_ready(PallasWeightedLoss(reduction="sum").reduce(x))
    assert jnp.allclose(out_sum, jnp.sum(x), rtol=1e-5, atol=1e-4), out_sum

    # 'none' -> identity
    out_none = PallasWeightedLoss(reduction="none").reduce(x)
    assert out_none.shape == x.shape

    # Weighted 'mean' (per-class weight, compact per-row path, fused in-kernel).
    w = jax.random.uniform(k2, (4,), dtype=jnp.float32) + 0.5
    out_wmean = jax.block_until_ready(
        PallasWeightedLoss(weight=w, reduction="mean").reduce(x))
    ref_wmean = jnp.mean(x * w.reshape(1, 4, 1, 1))
    assert jnp.allclose(out_wmean, ref_wmean, rtol=1e-5, atol=1e-5), out_wmean

    # bf16 loss fed in its native dtype (kernel upcasts per chunk), 'sum'.
    xb = x.astype(jnp.bfloat16)
    out_bsum = jax.block_until_ready(PallasWeightedLoss(reduction="sum").reduce(xb))
    ref_bsum = jnp.sum(xb.astype(jnp.float32))
    assert jnp.allclose(out_bsum.astype(jnp.float32), ref_bsum,
                        rtol=2e-2, atol=4.0), (out_bsum, ref_bsum)

    # Multi-block path with a zero-padded slab (1920 -> 2048 elems, 16 rows,
    # block_rows=8 -> grid of 2 full blocks).
    x2 = jax.random.uniform(k3, (3, 5, 8, 16), dtype=jnp.float32)
    out2 = jax.block_until_ready(loss_reduce(x2, "sum", block_rows=8))
    assert jnp.allclose(out2, jnp.sum(x2), rtol=1e-5, atol=1e-4), out2

    # Ragged tail-block path (24 rows, block_rows=16 -> 1 full + 8-row tail),
    # weighted via the compact per-row weight.
    x3 = jax.random.uniform(k4, (3, 2, 4, 128), dtype=jnp.float32)
    w3 = jnp.asarray([0.5, 2.0], jnp.float32)
    out3 = jax.block_until_ready(loss_reduce(x3, "sum", weight=w3, block_rows=16))
    ref3 = jnp.sum(x3 * w3.reshape(1, 2, 1, 1))
    assert jnp.allclose(out3, ref3, rtol=1e-5, atol=1e-4), (out3, ref3)

    # Fallback weighted path: weight axis whose trailing extent (16) is not
    # lane-aligned -> materialized f32 weight slab.
    w4 = jnp.linspace(0.5, 1.5, 16, dtype=jnp.float32)
    out4 = jax.block_until_ready(loss_reduce(x, "sum", weight=w4, weight_axis=2))
    ref4 = jnp.sum(x * w4.reshape(1, 1, 16, 1))
    assert jnp.allclose(out4, ref4, rtol=1e-5, atol=1e-4), (out4, ref4)

    # Default auto-tiled multi-block path (2048 rows -> 2 blocks, weighted).
    x5 = jax.random.uniform(k1, (64, 4, 32, 32), dtype=jnp.float32)
    out5 = jax.block_until_ready(
        PallasWeightedLoss(weight=w, reduction="mean").reduce(x5))
    ref5 = jnp.mean(x5 * w.reshape(1, 4, 1, 1))
    assert jnp.allclose(out5, ref5, rtol=1e-4, atol=1e-5), (out5, ref5)

    print("KERNEL_OK")
</pallas_src>

<mosaic_0001>
module attributes {stable_mosaic.version = 11 : i64} {
  func.func @_partial_sum_kernel(%arg0: i32, %arg1: memref<16x128xf32, #tpu.memory_space<vmem>>, %arg2: memref<1x8x128xf32, #tpu.memory_space<vmem>>) attributes {dimension_semantics = [#tpu.dimension_semantics<parallel>], iteration_bounds = array<i64: 1>, scalar_prefetch = 0 : i64, scratch_operands = 0 : i64, tpu.core_type = #tpu.core_type<tc>, window_params = [{transform_indices = @transform_0, window_bounds = array<i64: 16, 128>}, {transform_indices = @transform_1, window_bounds = array<i64: 1, 8, 128>}]} {
    %cst = arith.constant 0.000000e+00 : f32
    %0 = vector.broadcast %cst : f32 to vector<8x128xf32>
    %c0_i32 = arith.constant 0 : i32
    %c8_i32 = arith.constant 8 : i32
    %1 = arith.muli %c0_i32, %c8_i32 : i32
    %2 = tpu.assume_multiple %1, 8 : i32
    %3 = arith.index_cast %2 : i32 to index
    %c0 = arith.constant 0 : index
    %4 = vector.load %arg1[%3, %c0] : memref<16x128xf32, #tpu.memory_space<vmem>>, vector<8x128xf32>
    %5 = arith.addf %0, %4 : vector<8x128xf32>
    %c1_i32 = arith.constant 1 : i32
    %c8_i32_0 = arith.constant 8 : i32
    %6 = arith.muli %c1_i32, %c8_i32_0 : i32
    %7 = tpu.assume_multiple %6, 8 : i32
    %8 = arith.index_cast %7 : i32 to index
    %c0_1 = arith.constant 0 : index
    %9 = vector.load %arg1[%8, %c0_1] : memref<16x128xf32, #tpu.memory_space<vmem>>, vector<8x128xf32>
    %10 = arith.addf %5, %9 : vector<8x128xf32>
    %c2_i32 = arith.constant 2 : i32
    %c0_2 = arith.constant 0 : index
    %c0_3 = arith.constant 0 : index
    %c0_4 = arith.constant 0 : index
    %11 = vector.load %arg2[%c0_2, %c0_3, %c0_4] : memref<1x8x128xf32, #tpu.memory_space<vmem>>, vector<1x8x128xf32>
    %12 = vector.shape_cast %11 : vector<1x8x128xf32> to vector<8x128xf32>
    %13 = vector.shape_cast %10 : vector<8x128xf32> to vector<1x8x128xf32>
    tpu.vector_store %arg2[%c0_2, %c0_3, %c0_4], %13 {strides = array<i32>} : memref<1x8x128xf32, #tpu.memory_space<vmem>>, vector<1x8x128xf32>,
    return
  }
  func.func @transform_0(%arg0: i32) -> (i32, i32) {
    %c0_i32 = arith.constant 0 : i32
    %c0_i32_0 = arith.constant 0 : i32
    return %arg0, %c0_i32 : i32, i32
  }
  func.func @transform_1(%arg0: i32) -> (i32, i32, i32) {
    %c0_i32 = arith.constant 0 : i32
    %c0_i32_0 = arith.constant 0 : i32
    %c0_i32_1 = arith.constant 0 : i32
    return %arg0, %c0_i32, %c0_i32_0 : i32, i32, i32
  }
}

</mosaic_0001>

<bundles_post_ra>
// kernel: tpu_custom_call.1
= control target key start
LH: loop header
LB: loop body
LE: loop exit
PB: predicated region body
PF: predicated region fallthrough
CT: control target
= control target key end

     0   :  { %6 = vsyncpa [#allocation3], 0  ;;  %s134_s0 = inlined_call_operand.hbm [shape: f32[16,128], index: 0, kind: input, shape index: {}]   ;;  %s135_s1 = inlined_call_operand.hbm [shape: f32[1,8,128], index: 1, kind: output, shape index: {}]  }
   0x1   :  { %7 = vsyncpa [#allocation4], 0  ;;  %s96_s6 = smov [#allocation2]   ;;  %s48_s10 = scalar_lea.hbm %s134_s0, 256 }
   0x2   :  { %s13_s7 = sshll.u32 %s96_s6, 4  ;;  %p49_p0 = scmp.ne.s32.totalorder %s134_s0, %s48_s10  ;;  %s14_s7 = int_to_ptr.vmem [resolvable:$true] %s13_s7 }
   0x3   :  { %p52_p1 = scmp.lt.u32.totalorder %s48_s10, %s134_s0 }
   0x5   :  { %p54_p2 = pnand %p52_p1, %p49_p0 }
   0x7   :  { %57 = shalt.err (!%p54_p2)
}
   0x8   :  { %s58_s15 = scalar_lea.vmem %s14_s7, 256  ;;  %p63_p4 = scmp.lt.s32.totalorder %s14_s7, %s14_s7 }
   0x9   :  { %p59_p3 = scmp.ne.s32.totalorder %s14_s7, %s58_s15  ;;  %p64_p5 = scmp.lt.s32.totalorder %s58_s15, %s58_s15 }
   0xb   :  { %p65_p6 = por %p64_p5, %p63_p4 }
   0xd   :  { %p66_p7 = pnand %p65_p6, %p59_p3 }
   0xf   :  { %69 = shalt.err (!%p66_p7)
}
  0x10   :  { %s97_s16 = smov 128   ;;  %s98_s17 = smov 8  }
  0x11   :  { %19 = dma.hbm_to_vmem [thread:$0]  %s134_s0, 256, %s14_s7, [#allocation3], %s97_s16, %s97_s16, %s98_s17  }
  0x12   :  { %92 = dma.done.wait [#allocation3], 256  }
  0x13   :  { %93 = vsyncadd [#allocation3], 4294967040  ;;  %s99_s20 = smov [#allocation5]   ;;  %v23_v0 = vld [vmem:[#allocation2] sm:$0xff]  ;;  %v26_v1 = vld [vmem:[#allocation2 + $0x8] sm:$0xff] }
  0x14   :  { %s35_s21 = sshll.u32 %s99_s20, 4  ;;  %v27_v2 = vadd.f32 %v26_v1, %v23_v0  ;;  %s36_s21 = int_to_ptr.vmem [resolvable:$true] %s35_s21 }
  0x15   :  { %s70_s22 = scalar_lea.vmem %s36_s21, 128  ;;  %p75_p9 = scmp.lt.s32.totalorder %s36_s21, %s36_s21 }
  0x16   :  { %28 = vst [vmem:[#allocation5] sm:$0xff] %v27_v2  ;;  %p71_p8 = scmp.ne.s32.totalorder %s36_s21, %s70_s22  ;;  %p76_p10 = scmp.lt.s32.totalorder %s70_s22, %s70_s22 }
  0x18   :  { %p77_p11 = por %p76_p10, %p75_p9 }
  0x1a   :  { %p78_p12 = pnand %p77_p11, %p71_p8 }
  0x1c   :  { %81 = shalt.err (!%p78_p12)
}
  0x1d   :  { %s82_s0 = scalar_lea.hbm %s135_s1, 128 }
  0x1e   :  { %p83_p13 = scmp.ne.s32.totalorder %s135_s1, %s82_s0  ;;  %p86_p0 = scmp.lt.u32.totalorder %s82_s0, %s135_s1 }
  0x20   :  { %p88_p1 = pnand %p86_p0, %p83_p13 }
  0x22   :  { %91 = shalt.err (!%p88_p1)
}
  0x23   :  { %38 = dma.vmem_to_hbm [thread:$0]  %s36_s21, 128, %s135_s1, [#allocation4]  }
  0x24   :  { %94 = dma.done.wait [#allocation4], 128  }
  0x25   :  { %95 = vsyncadd [#allocation4], 4294967168 }
  0x26   :  { %42 = vsyncpa [#allocation3], 1 }
  0x27   :  { %43 = vsyncpa [#allocation4], 1 }

</bundles_post_ra>
